<compile_context>
chip_gen: v5e
topology: v5e:2x2
jax: 0.10.0
libtpu: 0.0.40
codegen_flags: <defaults>
</compile_context>

<pallas_src>
import functools

import jax
import jax.numpy as jnp
from jax import lax
from jax.experimental import pallas as pl
from jax.experimental.pallas import tpu as pltpu


def _round_up(v, m):
    return (v + m - 1) // m * m


def _vmem_capacity_bytes():
    # Generation-aware VMEM: v5e/v6e have 128 MiB/TC, v7x only 64 MiB/TC.
    try:
        return int(pltpu.get_tpu_info().vmem_capacity_bytes)
    except Exception:
        return 64 * 1024 * 1024  # conservative fallback (v7x per-TC size)


def _resident_spec(shape):
    # Constant index_map => the block never changes; single-buffer it so the
    # resident centers don't waste a second VMEM copy (matters on v7x/large C*D).
    try:
        return pl.BlockSpec(shape, lambda i: (0, 0), pipeline_mode=pl.Buffered(1))
    except (TypeError, AttributeError):
        return pl.BlockSpec(shape, lambda i: (0, 0))


def _dt_kernel(x_ref, ct_ref, c2_ref, *rest, num_valid, use_mask):
    # x_ref:  (TM, D)     f32        -- pipelined row tile
    # ct_ref: (D, C_pad)  f32/bf16   -- resident, pre-transposed, pre-scaled by 2
    # c2_ref: (1, C_pad)  f32        -- resident ||c||^2
    # mask_ref (only if use_mask): (1, C_pad) f32 0/1 validity mask
    # o_ref:  (TM, C_pad)            -- lane-dense output tile
    if use_mask:
        mask_ref, o_ref = rest
    else:
        (o_ref,) = rest

    x = x_ref[...]

    # Canonical (TM, D) x (D, C_pad) MXU matmul; equals 2 * x @ centers^T because
    # the factor 2 was folded into ct in the wrapper.
    cross = lax.dot_general(
        x.astype(ct_ref.dtype), ct_ref[...],
        dimension_numbers=(((1,), (0,)), ((), ())),
        preferred_element_type=jnp.float32,
    )  # (TM, C_pad)

    x2 = jnp.sum(x * x, axis=-1, keepdims=True)            # (TM, 1)
    d2 = jnp.maximum(x2 + (c2_ref[...] - cross), 0.0)
    dist = jnp.sqrt(d2)                                     # cdist p=2

    inv_c = jnp.float32(1.0 / num_valid)
    # torch.std is unbiased; replicate NaN output (like torch) when num_valid == 1.
    inv_dof = jnp.float32(1.0 / (num_valid - 1) if num_valid > 1 else float("nan"))

    if use_mask:
        mask = mask_ref[...]                                # (1, C_pad) 0/1
        mean = jnp.sum(dist * mask, axis=-1, keepdims=True) * inv_c
        neg_centered = mean - dist                          # == -(dist - mean)
        masked = neg_centered * mask
        var = jnp.sum(masked * masked, axis=-1, keepdims=True) * inv_dof
    else:
        mean = jnp.sum(dist, axis=-1, keepdims=True) * inv_c
        neg_centered = mean - dist
        var = jnp.sum(neg_centered * neg_centered, axis=-1, keepdims=True) * inv_dof

    inv_std = lax.rsqrt(var)                                # EUP, off the VALU path
    # Padded columns are garbage here; the wrapper slices them off.
    o_ref[...] = (neg_centered * inv_std).astype(o_ref.dtype)


def _choose_tiling(n, d, c_pad, cen_itemsize):
    n8 = _round_up(max(n, 1), 8)
    cap = _vmem_capacity_bytes()
    budget = int(cap * 0.75)                                # compiler/pipeline headroom

    resident = cen_itemsize * c_pad * d + 4 * 2 * c_pad     # centers^T + ||c||^2 + mask
    per_row = 4 * 2 * (d + c_pad)                           # double-buffered x + out rows

    # MiB-scale output tile per step amortizes the ~0.35us per-grid-step overhead.
    tm_target = _round_up(max((4 * 1024 * 1024) // (4 * c_pad), 8), 8)
    tm_fit = max(((budget - resident) // per_row) // 8 * 8, 8)
    tm = max(min(tm_target, tm_fit, n8), 8)
    # Keep >=2 grid steps when possible so "parallel" can shard rows across the
    # two TensorCores on v7x.
    if n8 > 8:
        tm = min(tm, _round_up(-(-n // 2), 8))

    n_pad = _round_up(n8, tm)
    needed = resident + per_row * tm
    vmem_limit = int(min(max(needed * 5 // 4, 32 * 1024 * 1024), cap * 9 // 10))
    vmem_limit = min(max(vmem_limit, needed), cap)          # never exceed physical VMEM
    return tm, n_pad, vmem_limit


@functools.partial(jax.jit, static_argnames=("out_dtype", "bf16_cross"))
def distance_transform(x, centers, *, out_dtype=jnp.float32, bf16_cross=False):
    x = jnp.asarray(x, jnp.float32)
    centers = jnp.asarray(centers, jnp.float32)
    n, d = x.shape
    c, d2 = centers.shape
    assert d == d2, "input_dim mismatch between x and centers"

    c_pad = _round_up(c, 128)            # lane-dense output last dim (unmasked vst)
    use_mask = c_pad != c
    cross_dtype = jnp.bfloat16 if bf16_cross else jnp.float32

    tm, n_pad, vmem_limit = _choose_tiling(n, d, c_pad, jnp.dtype(cross_dtype).itemsize)

    x_p = x if n_pad == n else jnp.pad(x, ((0, n_pad - n), (0, 0)))
    cen_p = centers if c_pad == c else jnp.pad(centers, ((0, c_pad - c), (0, 0)))
    # Hoisted resident operands: pre-transposed centers scaled by 2 (canonical MXU
    # layout, drops the per-element 2*cross multiply) and lane-aligned ||c||^2.
    cen_t = (2.0 * cen_p).T.astype(cross_dtype)             # (D, C_pad)
    c2 = jnp.sum(cen_p * cen_p, axis=-1)[None, :]           # (1, C_pad) f32

    in_specs = [
        pl.BlockSpec((tm, d), lambda i: (i, 0)),            # x row tile (pipelined)
        _resident_spec((d, c_pad)),                         # centers^T, resident
        _resident_spec((1, c_pad)),                         # ||c||^2, resident
    ]
    args = [x_p, cen_t, c2]
    if use_mask:
        mask = (jnp.arange(c_pad) < c).astype(jnp.float32)[None, :]
        in_specs.append(_resident_spec((1, c_pad)))         # validity mask, resident
        args.append(mask)

    out_pad = pl.pallas_call(
        functools.partial(_dt_kernel, num_valid=c, use_mask=use_mask),
        out_shape=jax.ShapeDtypeStruct((n_pad, c_pad), out_dtype),
        grid_spec=pltpu.PrefetchScalarGridSpec(
            num_scalar_prefetch=0,
            grid=(n_pad // tm,),
            in_specs=in_specs,
            out_specs=pl.BlockSpec((tm, c_pad), lambda i: (i, 0)),
        ),
        compiler_params=pltpu.CompilerParams(
            dimension_semantics=("parallel",),               # rows shard across TCs
            vmem_limit_bytes=vmem_limit,
        ),
    )(*args)

    return out_pad[:n, :c]


def _reference(x, centers):
    # Pure-JAX reference (same math as the PyTorch module, unbiased std).
    diff = x[:, None, :] - centers[None, :, :]
    dist = jnp.sqrt(jnp.sum(diff * diff, axis=-1))
    mean = jnp.mean(dist, axis=1, keepdims=True)
    centered = dist - mean
    var = jnp.sum(centered * centered, axis=1, keepdims=True) / (centers.shape[0] - 1)
    return -(centered / jnp.sqrt(var))


if __name__ == "__main__":
    key = jax.random.PRNGKey(0)
    k_x, k_centers = jax.random.split(key)

    batch = 8
    input_dim = 32
    num_centers = 16

    # centers ~ U[0, 1) like torch.rand(num_centers, input_dim); bias forced None.
    centers = jax.random.uniform(k_centers, (num_centers, input_dim), dtype=jnp.float32)
    x = jax.random.normal(k_x, (batch, input_dim), dtype=jnp.float32)

    out = distance_transform(x, centers)
    jax.block_until_ready(out)

    ref = _reference(x, centers)
    assert out.shape == (batch, num_centers)
    assert jnp.allclose(out, ref, atol=1e-4, rtol=1e-4), "mismatch vs reference"

    print("KERNEL_OK")
</pallas_src>

<mosaic_0001>
module attributes {stable_mosaic.version = 11 : i64} {
  func.func @_dt_kernel(%arg0: i32, %arg1: memref<8x32xf32, #tpu.memory_space<vmem>>, %arg2: memref<32x128xf32, #tpu.memory_space<vmem>>, %arg3: memref<1x128xf32, #tpu.memory_space<vmem>>, %arg4: memref<1x128xf32, #tpu.memory_space<vmem>>, %arg5: memref<8x128xf32, #tpu.memory_space<vmem>>) attributes {dimension_semantics = [#tpu.dimension_semantics<parallel>], iteration_bounds = array<i64: 1>, scalar_prefetch = 0 : i64, scratch_operands = 0 : i64, tpu.core_type = #tpu.core_type<tc>, window_params = [{transform_indices = @transform_0, window_bounds = array<i64: 8, 32>}, {pipeline_mode = #tpu.pipeline_mode<synchronous>, transform_indices = @transform_1, window_bounds = array<i64: 32, 128>}, {pipeline_mode = #tpu.pipeline_mode<synchronous>, transform_indices = @transform_2, window_bounds = array<i64: 1, 128>}, {pipeline_mode = #tpu.pipeline_mode<synchronous>, transform_indices = @transform_3, window_bounds = array<i64: 1, 128>}, {transform_indices = @transform_4, window_bounds = array<i64: 8, 128>}]} {
    %c0 = arith.constant 0 : index
    %c0_0 = arith.constant 0 : index
    %0 = vector.load %arg1[%c0, %c0_0] : memref<8x32xf32, #tpu.memory_space<vmem>>, vector<8x32xf32>
    %c0_1 = arith.constant 0 : index
    %c0_2 = arith.constant 0 : index
    %1 = vector.load %arg2[%c0_1, %c0_2] : memref<32x128xf32, #tpu.memory_space<vmem>>, vector<32x128xf32>
    %cst = arith.constant dense<0.000000e+00> : vector<8x128xf32>
    %2 = tpu.matmul %0, %1, %cst {dimension_numbers = #tpu.dot_dimension_numbers<[1], [0], [0], [1], [0, 0, 1, 1], [], []>} : vector<8x32xf32>, vector<32x128xf32>, vector<8x128xf32> -> vector<8x128xf32>
    %3 = arith.mulf %0, %0 : vector<8x32xf32>
    %cst_3 = arith.constant dense<0.000000e+00> : vector<8xf32>
    %4 = vector.multi_reduction <add>, %3, %cst_3 [1] : vector<8x32xf32> to vector<8xf32>
    %5 = vector.shape_cast %4 : vector<8xf32> to vector<8x1xf32>
    %c0_4 = arith.constant 0 : index
    %c0_5 = arith.constant 0 : index
    %6 = vector.load %arg3[%c0_4, %c0_5] : memref<1x128xf32, #tpu.memory_space<vmem>>, vector<1x128xf32>
    %7 = vector.broadcast %6 : vector<1x128xf32> to vector<8x128xf32>
    %8 = arith.subf %7, %2 : vector<8x128xf32>
    %9 = vector.broadcast %5 : vector<8x1xf32> to vector<8x128xf32>
    %10 = arith.addf %9, %8 : vector<8x128xf32>
    %cst_6 = arith.constant 0.000000e+00 : f32
    %11 = vector.broadcast %cst_6 : f32 to vector<8x128xf32>
    %12 = arith.maximumf %10, %11 : vector<8x128xf32>
    %13 = math.sqrt %12 : vector<8x128xf32>
    %c0_7 = arith.constant 0 : index
    %c0_8 = arith.constant 0 : index
    %14 = vector.load %arg4[%c0_7, %c0_8] : memref<1x128xf32, #tpu.memory_space<vmem>>, vector<1x128xf32>
    %15 = vector.broadcast %14 : vector<1x128xf32> to vector<8x128xf32>
    %16 = arith.mulf %13, %15 : vector<8x128xf32>
    %cst_9 = arith.constant dense<0.000000e+00> : vector<8xf32>
    %17 = vector.multi_reduction <add>, %16, %cst_9 [1] : vector<8x128xf32> to vector<8xf32>
    %18 = vector.shape_cast %17 : vector<8xf32> to vector<8x1xf32>
    %cst_10 = arith.constant 6.250000e-02 : f32
    %19 = vector.broadcast %cst_10 : f32 to vector<8x1xf32>
    %20 = arith.mulf %18, %19 : vector<8x1xf32>
    %21 = vector.broadcast %20 : vector<8x1xf32> to vector<8x128xf32>
    %22 = arith.subf %21, %13 : vector<8x128xf32>
    %23 = vector.broadcast %14 : vector<1x128xf32> to vector<8x128xf32>
    %24 = arith.mulf %22, %23 : vector<8x128xf32>
    %25 = arith.mulf %24, %24 : vector<8x128xf32>
    %cst_11 = arith.constant dense<0.000000e+00> : vector<8xf32>
    %26 = vector.multi_reduction <add>, %25, %cst_11 [1] : vector<8x128xf32> to vector<8xf32>
    %27 = vector.shape_cast %26 : vector<8xf32> to vector<8x1xf32>
    %cst_12 = arith.constant 0.0666666701 : f32
    %28 = vector.broadcast %cst_12 : f32 to vector<8x1xf32>
    %29 = arith.mulf %27, %28 : vector<8x1xf32>
    %30 = math.rsqrt %29 : vector<8x1xf32>
    %31 = vector.broadcast %30 : vector<8x1xf32> to vector<8x128xf32>
    %32 = arith.mulf %22, %31 : vector<8x128xf32>
    %c0_13 = arith.constant 0 : index
    %c0_14 = arith.constant 0 : index
    %33 = vector.load %arg5[%c0_13, %c0_14] : memref<8x128xf32, #tpu.memory_space<vmem>>, vector<8x128xf32>
    tpu.vector_store %arg5[%c0_13, %c0_14], %32 {strides = array<i32>} : memref<8x128xf32, #tpu.memory_space<vmem>>, vector<8x128xf32>,
    return
  }
  func.func @transform_0(%arg0: i32) -> (i32, i32) {
    %c0_i32 = arith.constant 0 : i32
    %c0_i32_0 = arith.constant 0 : i32
    return %arg0, %c0_i32 : i32, i32
  }
  func.func @transform_1(%arg0: i32) -> (i32, i32) {
    %c0_i32 = arith.constant 0 : i32
    %c0_i32_0 = arith.constant 0 : i32
    %c0_i32_1 = arith.constant 0 : i32
    return %c0_i32, %c0_i32_0 : i32, i32
  }
  func.func @transform_2(%arg0: i32) -> (i32, i32) {
    %c0_i32 = arith.constant 0 : i32
    %c0_i32_0 = arith.constant 0 : i32
    %c0_i32_1 = arith.constant 0 : i32
    return %c0_i32, %c0_i32_0 : i32, i32
  }
  func.func @transform_3(%arg0: i32) -> (i32, i32) {
    %c0_i32 = arith.constant 0 : i32
    %c0_i32_0 = arith.constant 0 : i32
    %c0_i32_1 = arith.constant 0 : i32
    return %c0_i32, %c0_i32_0 : i32, i32
  }
  func.func @transform_4(%arg0: i32) -> (i32, i32) {
    %c0_i32 = arith.constant 0 : i32
    %c0_i32_0 = arith.constant 0 : i32
    return %arg0, %c0_i32 : i32, i32
  }
}

</mosaic_0001>

<bundles_post_ra>
// kernel: distance_transform.1
= control target key start
LH: loop header
LB: loop body
LE: loop exit
PB: predicated region body
PF: predicated region fallthrough
CT: control target
= control target key end

     0   :  { %s196_s0 = inlined_call_operand.vmem [shape: f32[8,32], index: 0, kind: input, shape index: {}]   ;;  %s197_s1 = inlined_call_operand.vmem [shape: f32[32,128], index: 1, kind: input, shape index: {}]   ;;  %s198_s2 = inlined_call_operand.vmem [shape: f32[1,128], index: 2, kind: input, shape index: {}]   ;;  %s199_s3 = inlined_call_operand.vmem [shape: f32[1,128], index: 3, kind: input, shape index: {}]   ;;  %s200_s4 = inlined_call_operand.hbm [shape: f32[8,128], index: 4, kind: output, shape index: {}]  }
   0x1   :  { %v22_v0 = vld [vmem:[%s197_s1 + $0x18] sm:$0xff]  ;;  %v21_v1 = vld [vmem:[%s197_s1 + $0x10] sm:$0xff]  ;;  %v18_v2 = vld [vmem:[%s196_s0] sm:$0xff] }
   0x2   :  { %39 = vmatpush.msra.mxu0 %v22_v0  ;;  %v20_v3 = vld [vmem:[%s197_s1 + $0x8] sm:$0xff]  ;;  %v47_v4 = vmul.f32 %v18_v2, %v18_v2 }
   0x3   :  { %9 = vsyncpa [#allocation3], 0  ;;  %vm23_vm0 = vcmask 261120   ;;  %v19_v5 = vld [vmem:[%s197_s1] sm:$0xff]  ;;  %s103_s29 = sshll.u32 %s200_s4, 4  ;;  %s104_s29 = int_to_ptr.hbm [resolvable:$true] %s103_s29 }
   0x4   :  { %40 = vmatpush.msra.mxu0 %v21_v1  ;;  %v48_v6 = vsel %vm23_vm0, %v47_v4, 0.0  ;;  %v114_v7 = vld [vmem:[%s198_s2] ss:$0 sm:$0xff]  ;;  %s146_s2 = smov [#allocation2]  }
   0x5   :  { %49 = vadd.xlane.f32.xlu0 %v48_v6  ;;  %v115_v20 = vld [vmem:[%s199_s3] ss:$0 sm:$0xff]  ;;  %s101_s3 = sshll.u32 %s146_s2, 4  ;;  %s102_s3 = int_to_ptr.vmem [resolvable:$true] %s101_s3 }
   0x6   :  { %41 = vmatpush.msra.mxu0 %v20_v3 }
   0x8   :  { %42 = vmatpush.msra.mxu0 %v19_v5 }
   0x9   :  { %112 = vmatmul.msk.f32.vlgmr.msra.gmra.mxu0 %vm23_vm0, %v18_v2 }
  0x78   :  { %v50_v9 = vpop.xlane.xlu0 %49 }
  0x86   :  { %v44_v8 = vpop.f32.mrf.mxu0 }
  0x87   :  { %v55_v10 = vsub.f32 %v114_v7, %v44_v8 }
  0x89   :  { %v56_v11 = vadd.f32 %v55_v10, %v50_v9 }
  0x8b   :  { %v57_v12 = vmax.f32 %v56_v11, 0.0 }
  0x8d   :  { %116 = vrsqrt.f32 %v57_v12  ;;  %vm65_vm1 = vcmp.eq.f32.partialorder %v57_v12, inf  ;;  %v68_v21 = vand.u32 2147483648, %v57_v12  ;;  %vm67_vm2 = vcmp.eq.f32.partialorder %v57_v12, 0.0 }
  0x93   :  { %v117_v13 = vpop.eup %116 }
  0x94   :  { %v59_v14 = vmul.f32 %v117_v13, %v57_v12 }
  0x96   :  { %v60_v15 = vmul.f32 %v117_v13, %v59_v14 }
  0x98   :  { %v61_v16 = vmul.f32 0.5, %v60_v15 }
  0x9a   :  { %v62_v17 = vsub.f32 1.5, %v61_v16 }
  0x9c   :  { %v63_v18 = vmul.f32 %v117_v13, %v62_v17 }
  0x9e   :  { %v64_v19 = vmul.f32 %v63_v18, %v57_v12 }
  0xa0   :  { %v66_v22 = vsel %vm65_vm1, %v57_v12, %v64_v19 }
  0xa1   :  { %v69_v23 = vsel %vm67_vm2, %v68_v21, %v66_v22 }
  0xa2   :  { %v74_v24 = vmul.f32 %v115_v20, %v69_v23 }
  0xa4   :  { %75 = vadd.xlane.f32.xlu0 %v74_v24 }
 0x117   :  { %v76_v25 = vpop.xlane.xlu0 %75 }
 0x118   :  { %v77_v26 = vmul.f32 0.0625, %v76_v25 }
 0x11a   :  { %v78_v27 = vsub.f32 %v77_v26, %v69_v23 }
 0x11c   :  { %v79_v28 = vmul.f32 %v115_v20, %v78_v27 }
 0x11e   :  { %v80_v29 = vmul.f32 %v79_v28, %v79_v28 }
 0x120   :  { %81 = vadd.xlane.f32.xlu1 %v80_v29 }
 0x193   :  { %v82_v30 = vpop.xlane.xlu1 %81 }
 0x194   :  { %v83_v31 = vmul.f32 0.06666667, %v82_v30 }
 0x196   :  { %118 = vrsqrt.f32 %v83_v31  ;;  %vm90_vm4 = vweird.f32 %v83_v31 }
 0x19c   :  { %v119_v32 = vpop.eup %118 }
 0x19d   :  { %v85_v33 = vmul.f32 %v119_v32, %v83_v31  ;;  %vm91_vm3 = vweird.f32 %v119_v32 }
 0x19e   :  { %vm92_vm5 = vmor %vm90_vm4, %vm91_vm3 }
 0x19f   :  { %v86_v34 = vmul.f32 %v119_v32, %v85_v33 }
 0x1a1   :  { %v87_v35 = vmul.f32 0.5, %v86_v34 }
 0x1a3   :  { %v88_v36 = vsub.f32 1.5, %v87_v35 }
 0x1a5   :  { %v89_v37 = vmul.f32 %v119_v32, %v88_v36 }
 0x1a7   :  { %v93_v38 = vsel %vm92_vm5, %v119_v32, %v89_v37 }
 0x1a8   :  { %v94_v39 = vmul.f32 %v93_v38, %v78_v27 }
 0x1aa   :  { %95 = vst [vmem:[#allocation2] sm:$0xff] %v94_v39 }
 0x1ab   :  { %106 = dma.vmem_to_hbm [thread:$0]  %s102_s3, 128, %s104_s29, [#allocation3]  }
 0x1ac   :  { %144 = dma.done.wait [#allocation3], 128  }
 0x1ad   :  { %145 = vsyncadd [#allocation3], 4294967168 }
 0x1ae   :  { %111 = vsyncpa [#allocation3], 1 }

</bundles_post_ra>
